<compile_context>
chip_gen: v7x
topology: tpu7x:2x2x1
jax: 0.10.0
libtpu: 0.0.40
codegen_flags: <defaults>
</compile_context>

<pallas_src>
import functools
import math

import jax
import jax.numpy as jnp
from jax.experimental import pallas as pl
from jax.experimental.pallas import tpu as pltpu


# ----------------------------------------------------------------------------
# pltpu.roll direction probe (one tiny kernel, run once and cached).
# pltpu.roll is expected to match jnp.roll (out[i] = in[i - shift]); this probe
# makes the main kernel robust to either convention.  Call outside jax.jit.
# ----------------------------------------------------------------------------
@functools.lru_cache(maxsize=None)
def _roll_matches_jnp_roll() -> bool:
    def probe(x_ref, o_ref):
        o_ref[...] = pltpu.roll(x_ref[...], 1, 1)

    x = jnp.broadcast_to(jnp.arange(128, dtype=jnp.float32), (8, 128))
    y = pl.pallas_call(
        probe, out_shape=jax.ShapeDtypeStruct((8, 128), jnp.float32)
    )(x)
    return bool(y[0, 1] == 0.0)  # jnp.roll semantics: y[1] = x[0] = 0


# ----------------------------------------------------------------------------
# Kernel: all `_iter` iterations fused over a block of whole planes, laid out
# as a 2D slab (tile_p * H rows, Wpad lanes).
# ----------------------------------------------------------------------------
def _soft_skel_kernel(hpos_ref, x_ref, o_ref, *, n_iter, plane_h, true_w,
                      apply_sigmoid, roll_like_jnp):
    m = x_ref[...].astype(jnp.float32)          # (R, Wp): tile_p planes x H rows
    if apply_sigmoid:                           # AbstractLoss.activate(sigmoid=True)
        m = jax.nn.sigmoid(m)
    n_rows, n_cols = m.shape

    # --- boundary masks: built ONCE, reused by every pool of every iteration.
    hpos = hpos_ref[...]                        # (R, 1) int32 row-index-in-plane
    h_first = hpos == 0
    h_last = hpos == (plane_h - 1)
    col = jax.lax.broadcasted_iota(jnp.int32, (n_rows, n_cols), 1)
    w_first = col == 0
    w_last = col == (true_w - 1)
    pos_inf = jnp.float32(jnp.inf)
    neg_inf = jnp.float32(-jnp.inf)

    def shift(x, axis, direction, fill):
        # y[..., i, ...] = x[..., i + direction, ...]; neighbours outside the
        # plane (H plane boundary) or outside the true image width (W) are
        # replaced by `fill`, reproducing torch's implicitly padded max_pool2d.
        n = x.shape[axis]
        amt = (-direction) % n if roll_like_jnp else direction % n
        rolled = pltpu.roll(x, amt, axis)
        if axis == 0:
            mask = h_last if direction == 1 else h_first
        else:
            mask = w_last if direction == 1 else w_first
        return jnp.where(mask, fill, rolled)

    def erode(x):
        # min(minpool_3x1, minpool_1x3) == 5-way min over the plus-neighbourhood.
        e = jnp.minimum(shift(x, 0, 1, pos_inf), shift(x, 0, -1, pos_inf))
        e = jnp.minimum(e, shift(x, 1, 1, pos_inf))
        e = jnp.minimum(e, shift(x, 1, -1, pos_inf))
        return jnp.minimum(e, x)

    def dilate(x):
        # Separable 3x3 max pool with implicit -inf padding.
        y = jnp.maximum(x, jnp.maximum(shift(x, 0, 1, neg_inf),
                                       shift(x, 0, -1, neg_inf)))
        return jnp.maximum(y, jnp.maximum(shift(y, 1, 1, neg_inf),
                                          shift(y, 1, -1, neg_inf)))

    # Erode-cached soft_skel: e_j = erode(m_j) is reused as m_{j+1}.
    e = erode(m)
    skel = jnp.maximum(m - dilate(e), 0.0)
    for _ in range(n_iter):                     # small static unroll (default 5)
        m = e
        e = erode(m)
        delta = jnp.maximum(m - dilate(e), 0.0)
        skel = skel + jnp.maximum(delta - skel * delta, 0.0)
    o_ref[...] = skel.astype(o_ref.dtype)


# ----------------------------------------------------------------------------
# Wrapper
# ----------------------------------------------------------------------------
def _choose_tile_p(bc, plane_h, plane_bytes):
    by_bytes = max(1, (1 << 20) // plane_bytes)   # ~1 MiB of input per block
    by_steps = max(1, -(-bc // 8))                # keep >= ~8 grid steps (v7x 2 TCs)
    tile_p = max(1, min(bc, by_bytes, by_steps))
    # Mosaic (8,128) rule: second-minor block dim (tile_p*H) must be a multiple
    # of 8 unless the block spans the full row axis.
    if tile_p < bc and (tile_p * plane_h) % 8:
        g = 8 // math.gcd(plane_h, 8)
        tile_p = min(bc, max(g, (tile_p // g) * g))
    return tile_p


def soft_skeletonization(binary_mask, n_iter=5, apply_sigmoid=False):
    """SoftSkeletonization.soft_skel equivalent for 4D [B, C, H, W] inputs.

    Note: calls a tiny probe kernel once (cached); do not wrap this function
    itself in jax.jit.
    """
    # TODO(synk): the 5D volumetric branch of _soft_erode/_soft_dilate and
    # AbstractLoss.ignor_diagonal (diagonal=True) are not implemented.
    assert binary_mask.ndim == 4, "only 4D [B, C, H, W] supported"
    B, C, H, W = binary_mask.shape
    bc = B * C

    # Lane-dense 2D layout: all planes stacked along sublanes -> (B*C*H, W).
    x2d = binary_mask.reshape(bc * H, W)
    # Pad W up to a lane multiple so lane rolls / stores are 128-aligned.
    # TODO(synk): for very small W, packing several planes per lane row would
    # use the vregs better than zero padding.
    wp = (-(-W // 128) * 128) if (W % 128) else W
    if wp != W:
        x2d = jnp.pad(x2d, ((0, 0), (0, wp - W)))

    tile_p = _choose_tile_p(bc, H, H * wp * 4)
    block_rows = tile_p * H
    grid = (pl.cdiv(bc, tile_p),)

    # Per-row "row index within plane" helper (identical for every grid step).
    hpos = jnp.tile(jnp.arange(H, dtype=jnp.int32), tile_p).reshape(block_rows, 1)

    kernel = functools.partial(
        _soft_skel_kernel,
        n_iter=int(n_iter),
        plane_h=H,
        true_w=W,
        apply_sigmoid=bool(apply_sigmoid),
        roll_like_jnp=_roll_matches_jnp_roll(),
    )
    out2d = pl.pallas_call(
        kernel,
        out_shape=jax.ShapeDtypeStruct((bc * H, wp), jnp.float32),
        grid_spec=pltpu.PrefetchScalarGridSpec(
            num_scalar_prefetch=0,
            grid=grid,
            in_specs=[
                pl.BlockSpec((block_rows, 1), lambda i: (0, 0)),
                pl.BlockSpec((block_rows, wp), lambda i: (i, 0)),
            ],
            out_specs=pl.BlockSpec((block_rows, wp), lambda i: (i, 0)),
        ),
        compiler_params=pltpu.CompilerParams(
            dimension_semantics=("parallel",),
            vmem_limit_bytes=48 * 1024 * 1024,
        ),
    )(hpos, x2d)

    if wp != W:
        out2d = out2d[:, :W]
    return out2d.reshape(B, C, H, W)


# ----------------------------------------------------------------------------
# Pure-JAX reference (mirrors the torch code with -inf-padded max pooling).
# ----------------------------------------------------------------------------
def _ref_maxpool(x, window_hw, pad_hw):
    wh, ww = window_hw
    ph, pw = pad_hw
    return jax.lax.reduce_window(
        x,
        jnp.array(-jnp.inf, x.dtype),
        jax.lax.max,
        window_dimensions=(1, 1, wh, ww),
        window_strides=(1, 1, 1, 1),
        padding=((0, 0), (0, 0), (ph, ph), (pw, pw)),
    )


def _ref_erode(m):
    p1 = -_ref_maxpool(-m, (3, 1), (1, 0))
    p2 = -_ref_maxpool(-m, (1, 3), (0, 1))
    return jnp.minimum(p1, p2)


def _ref_dilate(m):
    return _ref_maxpool(m, (3, 3), (1, 1))


def _ref_open(m):
    return _ref_dilate(_ref_erode(m))


def _ref_soft_skel(m, n_iter):
    m = m.astype(jnp.float32)
    skel = jax.nn.relu(m - _ref_open(m))
    for _ in range(n_iter):
        m = _ref_erode(m)
        delta = jax.nn.relu(m - _ref_open(m))
        skel = skel + jax.nn.relu(delta - skel * delta)
    return skel


if __name__ == "__main__":
    key = jax.random.PRNGKey(0)
    k1, k2 = jax.random.split(key)

    B, C, H, W = 2, 4, 16, 16
    n_iter = 5

    # 1) Binary target mask (the typical soft-skeletonization input).
    binary = (jax.random.uniform(k1, (B, C, H, W)) > 0.5).astype(jnp.float32)
    out_bin = jax.block_until_ready(soft_skeletonization(binary, n_iter))
    ref_bin = _ref_soft_skel(binary, n_iter)
    assert out_bin.shape == binary.shape
    assert jnp.allclose(out_bin, ref_bin, rtol=1e-5, atol=1e-6), float(
        jnp.max(jnp.abs(out_bin - ref_bin))
    )

    # 2) Soft (probability) mask with values in (0, 1).
    logits = jax.random.normal(k2, (B, C, H, W), dtype=jnp.float32)
    soft = jax.nn.sigmoid(logits)
    out_soft = jax.block_until_ready(soft_skeletonization(soft, n_iter))
    ref_soft = _ref_soft_skel(soft, n_iter)
    assert jnp.allclose(out_soft, ref_soft, rtol=1e-5, atol=1e-6), float(
        jnp.max(jnp.abs(out_soft - ref_soft))
    )

    # 3) In-kernel sigmoid path (AbstractLoss.activate with sigmoid=True).
    out_sig = jax.block_until_ready(
        soft_skeletonization(logits, n_iter, apply_sigmoid=True)
    )
    assert jnp.allclose(out_sig, ref_soft, rtol=1e-4, atol=1e-4), float(
        jnp.max(jnp.abs(out_sig - ref_soft))
    )

    print("KERNEL_OK")
</pallas_src>

<mosaic_0001>
module attributes {stable_mosaic.version = 11 : i64} {
  func.func @probe(%arg0: memref<8x128xf32, #tpu.memory_space<vmem>>, %arg1: memref<8x128xf32, #tpu.memory_space<vmem>>) attributes {dimension_semantics = [], scalar_prefetch = 0 : i64, scratch_operands = 0 : i64, tpu.core_type = #tpu.core_type<tc>} {
    %c0 = arith.constant 0 : index
    %c0_0 = arith.constant 0 : index
    %0 = vector.load %arg0[%c0, %c0_0] : memref<8x128xf32, #tpu.memory_space<vmem>>, vector<8x128xf32>
    %c1_i32 = arith.constant 1 : i32
    %1 = tpu.dynamic_rotate %0 by %c1_i32 dim 1 : vector<8x128xf32>, i32 -> vector<8x128xf32>
    %c0_1 = arith.constant 0 : index
    %c0_2 = arith.constant 0 : index
    %2 = vector.load %arg1[%c0_1, %c0_2] : memref<8x128xf32, #tpu.memory_space<vmem>>, vector<8x128xf32>
    tpu.vector_store %arg1[%c0_1, %c0_2], %1 {strides = array<i32>} : memref<8x128xf32, #tpu.memory_space<vmem>>, vector<8x128xf32>,
    return
  }
}

</mosaic_0001>

<bundles_post_ra>
// kernel: tpu_custom_call.1
= control target key start
LH: loop header
LB: loop body
LE: loop exit
PB: predicated region body
PF: predicated region fallthrough
CT: control target
= control target key end

     0   :  { %6 = vsyncpa [#allocation3], 0  ;;  %s128_s0 = inlined_call_operand.hbm [shape: f32[8,128], index: 0, kind: input, shape index: {}]   ;;  %s129_s1 = inlined_call_operand.hbm [shape: f32[8,128], index: 1, kind: output, shape index: {}]  }
   0x1   :  { %7 = vsyncpa [#allocation4], 0  ;;  %s91_s6 = smov [#allocation2]   ;;  %s43_s10 = scalar_lea.hbm %s128_s0, 128 }
   0x2   :  { %s14_s7 = sshll.u32 %s91_s6, 4  ;;  %p44_p0 = scmp.ne.s32.totalorder %s128_s0, %s43_s10  ;;  %s15_s7 = int_to_ptr.vmem [resolvable:$true] %s14_s7 }
   0x3   :  { %p47_p1 = scmp.lt.u32.totalorder %s43_s10, %s128_s0 }
   0x5   :  { %p49_p2 = pnand %p47_p1, %p44_p0 }
   0x7   :  { %52 = shalt.err (!%p49_p2)
}
   0x8   :  { %s53_s15 = scalar_lea.vmem %s15_s7, 128  ;;  %p58_p4 = scmp.lt.s32.totalorder %s15_s7, %s15_s7 }
   0x9   :  { %p54_p3 = scmp.ne.s32.totalorder %s15_s7, %s53_s15  ;;  %p59_p5 = scmp.lt.s32.totalorder %s53_s15, %s53_s15 }
   0xb   :  { %p60_p6 = por %p59_p5, %p58_p4 }
   0xd   :  { %p61_p7 = pnand %p60_p6, %p54_p3 }
   0xf   :  { %64 = shalt.err (!%p61_p7)
}
  0x10   :  { %17 = dma.hbm_to_vmem [thread:$0]  %s128_s0, 128, %s15_s7, [#allocation3]  }
  0x11   :  { %87 = dma.done.wait [#allocation3], 128  }
  0x12   :  { %88 = vsyncadd [#allocation3], 4294967168  ;;  %v21_v0 = vld [vmem:[#allocation2] sm:$0xff]  ;;  %s92_s18 = smov 1   ;;  %s93_s19 = smov [#allocation5]  }
  0x13   :  { %22 = vrot.lane.b32.xlu0 %v21_v0, %s92_s18  ;;  %s31_s20 = sshll.u32 %s93_s19, 4  ;;  %s32_s20 = int_to_ptr.vmem [resolvable:$true] %s31_s20 }
  0x14   :  { %s65_s21 = scalar_lea.vmem %s32_s20, 128  ;;  %p70_p9 = scmp.lt.s32.totalorder %s32_s20, %s32_s20 }
  0x15   :  { %p66_p8 = scmp.ne.s32.totalorder %s32_s20, %s65_s21  ;;  %p71_p10 = scmp.lt.s32.totalorder %s65_s21, %s65_s21 }
  0x17   :  { %p72_p11 = por %p71_p10, %p70_p9 }
  0x19   :  { %p73_p12 = pnand %p72_p11, %p66_p8 }
  0x85   :  { %v23_v1 = vpop.permute.xlu0 %22 }
  0x86   :  { %24 = vst [vmem:[#allocation5] sm:$0xff] %v23_v1 }
  0x87   :  { %76 = shalt.err (!%p73_p12)
}
  0x88   :  { %s77_s0 = scalar_lea.hbm %s129_s1, 128 }
  0x89   :  { %p78_p13 = scmp.ne.s32.totalorder %s129_s1, %s77_s0  ;;  %p81_p0 = scmp.lt.u32.totalorder %s77_s0, %s129_s1 }
  0x8b   :  { %p83_p1 = pnand %p81_p0, %p78_p13 }
  0x8d   :  { %86 = shalt.err (!%p83_p1)
}
  0x8e   :  { %34 = dma.vmem_to_hbm [thread:$0]  %s32_s20, 128, %s129_s1, [#allocation4]  }
  0x8f   :  { %89 = dma.done.wait [#allocation4], 128  }
  0x90   :  { %90 = vsyncadd [#allocation4], 4294967168 }
  0x91   :  { %38 = vsyncpa [#allocation3], 1 }
  0x92   :  { %39 = vsyncpa [#allocation4], 1 }

</bundles_post_ra>
